<compile_context>
chip_gen: v5e
topology: v5e:2x2
jax: 0.10.0
libtpu: 0.0.40
codegen_flags: <defaults>
</compile_context>

<pallas_src>
import functools

import jax
import jax.numpy as jnp
from jax import lax
from jax.experimental import pallas as pl
from jax.experimental.pallas import tpu as pltpu

LANES = 128          # vreg lane width
SUBLANES = 8         # f32 vreg sublane count (accumulator height)
MAX_ROW_TILE = 4096  # rows per grid step; 4096x128 f32 = 2 MiB per input per buffer

_num_cores_cache = None


def _num_tensorcores():
    """Best-effort TensorCore count (2 on v7x, 1 on v5e/v6e). Falls back to 1."""
    global _num_cores_cache
    if _num_cores_cache is not None:
        return _num_cores_cache
    cores = 1
    try:
        info = pltpu.get_tpu_info()
        for name in ("num_cores", "core_count", "num_tensorcores",
                     "tensor_core_count", "cores_per_chip", "num_cores_per_chip"):
            v = getattr(info, name, None)
            if isinstance(v, int) and 1 <= v <= 8:
                cores = v
                break
    except Exception:
        cores = 1
    _num_cores_cache = cores
    return cores


def _margin_loss_kernel(margin_ref, pos_ref, neg_ref, out_ref, acc_ref,
                        *, rows, row_tile, tiles_per_shard):
    s = pl.program_id(0)                 # shard axis ("parallel")
    i = pl.program_id(1)                 # tile within shard ("arbitrary")

    @pl.when(i == 0)
    def _():
        acc_ref[...] = jnp.zeros_like(acc_ref)

    m = margin_ref[0]                    # margin (SMEM scalar prefetch)

    # Unclamped logical tile id; rem = valid rows remaining from this tile's
    # base.  All index arithmetic is in *row* units (rows = n/128), so it stays
    # comfortably inside int32 even for very large inputs.
    t = s * tiles_per_shard + i
    rem = rows - t * row_tile

    pos = pos_ref[...].astype(jnp.float32)
    neg = neg_ref[...].astype(jnp.float32)
    hinge = jnp.maximum(pos - neg + m, 0.0)

    def fold(h):
        # (row_tile, 128) -> (8, 128): pure VPU adds; keeps the per-step
        # accumulator read-modify-write at 8 vregs instead of row_tile/8 * 8.
        return jnp.sum(h.reshape(row_tile // SUBLANES, SUBLANES, LANES), axis=0)

    @pl.when(rem >= row_tile)
    def _():
        # Fast path: fully interior tile -> no mask work at all.
        acc_ref[...] += fold(hinge)

    @pl.when(rem < row_tile)
    def _():
        # Slow path: the single partial tile (0 < rem < row_tile) or a clamped
        # overhang tile (rem <= 0).  Compare tile-local row ids against rem.
        row_ids = lax.broadcasted_iota(jnp.int32, (row_tile, LANES), 0)
        acc_ref[...] += fold(jnp.where(row_ids < rem, hinge, 0.0))

    @pl.when(i == tiles_per_shard - 1)
    def _():
        out_ref[0] = acc_ref[...]        # per-shard (8,128) partial sum


def margin_loss(pos, neg, margin):
    """sum(max(pos - neg + margin, 0)) with the bulk computed in a Pallas kernel."""
    pos_flat = pos.reshape(-1)
    neg_flat = neg.reshape(-1)
    n = pos_flat.shape[0]
    m32 = jnp.asarray(margin, jnp.float32)

    # Main slab: the largest prefix that is a whole number of (8 x 128) vregs.
    # Zero-offset slice + reshape (aliasable, no copy); the remainder goes to a
    # tiny XLA epilogue instead of a jnp.pad copy of the whole input.
    rows = (n // (SUBLANES * LANES)) * SUBLANES
    n_main = rows * LANES

    total = jnp.float32(0.0)

    if rows > 0:
        pos2d = pos_flat[:n_main].reshape(rows, LANES)
        neg2d = neg_flat[:n_main].reshape(rows, LANES)

        # Tile: either the full row extent (rows is a multiple of 8, and
        # "equals full array dims" is always layout-legal) or a 32-sublane
        # aligned MAX_ROW_TILE (legal for f32 / bf16 / int8 sublane packing).
        row_tile = rows if rows <= MAX_ROW_TILE else MAX_ROW_TILE
        total_tiles = pl.cdiv(rows, row_tile)
        num_shards = max(1, min(_num_tensorcores(), total_tiles))
        tiles_per_shard = pl.cdiv(total_tiles, num_shards)
        last_tile = total_tiles - 1

        kernel = functools.partial(
            _margin_loss_kernel,
            rows=rows, row_tile=row_tile, tiles_per_shard=tiles_per_shard)

        def in_map(s, i, m_ref):
            # Clamp overhanging tiles of the last shard onto the last real
            # tile; their contribution is zeroed in-kernel (rem <= 0).
            return (jnp.minimum(s * tiles_per_shard + i, last_tile), 0)

        partials = pl.pallas_call(
            kernel,
            out_shape=jax.ShapeDtypeStruct((num_shards, SUBLANES, LANES),
                                           jnp.float32),
            grid_spec=pltpu.PrefetchScalarGridSpec(
                num_scalar_prefetch=1,                 # margin lives in SMEM
                grid=(num_shards, tiles_per_shard),
                in_specs=[
                    pl.BlockSpec((row_tile, LANES), in_map),
                    pl.BlockSpec((row_tile, LANES), in_map),
                ],
                out_specs=pl.BlockSpec((1, SUBLANES, LANES),
                                       lambda s, i, m_ref: (s, 0, 0)),
                scratch_shapes=[pltpu.VMEM((SUBLANES, LANES), jnp.float32)],
            ),
            compiler_params=pltpu.CompilerParams(
                # NOTE: on v7x, pltpu.CORE_PARALLEL on the shard axis (or an
                # explicit pl.core_map) may be needed for a true 2-TC split.
                dimension_semantics=("parallel", "arbitrary"),
            ),
        )(m32.reshape((1,)), pos2d, neg2d)

        total = total + jnp.sum(partials)

    if n_main < n:
        # <= 1023-element tail: negligible, done in plain XLA (no pad copy).
        tail_p = pos_flat[n_main:].astype(jnp.float32)
        tail_n = neg_flat[n_main:].astype(jnp.float32)
        total = total + jnp.sum(jnp.maximum(tail_p - tail_n + m32, 0.0))

    return total


if __name__ == "__main__":
    key = jax.random.PRNGKey(0)
    k1, k2 = jax.random.split(key)

    # Small shapes consistent with a generic (batched) score tensor.
    pos = jax.random.normal(k1, (2, 4, 16, 16), dtype=jnp.float32)
    neg = jax.random.normal(k2, (2, 4, 16, 16), dtype=jnp.float32)
    margin = 1.0

    loss = jax.block_until_ready(margin_loss(pos, neg, margin))

    # Reference (plain JAX) check of the forward semantics.
    ref = jnp.sum(jnp.maximum(pos - neg + margin, 0.0))
    assert jnp.allclose(loss, ref, rtol=1e-4, atol=1e-4), (loss, ref)

    print("KERNEL_OK")
</pallas_src>

<mosaic_0001>
module attributes {stable_mosaic.version = 11 : i64} {
  func.func @_margin_loss_kernel(%arg0: i32, %arg1: i32, %arg2: memref<1xf32, #tpu.memory_space<smem>>, %arg3: memref<16x128xf32, #tpu.memory_space<vmem>>, %arg4: memref<16x128xf32, #tpu.memory_space<vmem>>, %arg5: memref<1x8x128xf32, #tpu.memory_space<vmem>>, %arg6: memref<8x128xf32, #tpu.memory_space<vmem>>) attributes {dimension_semantics = [#tpu.dimension_semantics<parallel>, #tpu.dimension_semantics<arbitrary>], iteration_bounds = array<i64: 1, 1>, scalar_prefetch = 1 : i64, scratch_operands = 1 : i64, tpu.core_type = #tpu.core_type<tc>, window_params = [{transform_indices = @transform_0, window_bounds = array<i64: 16, 128>}, {transform_indices = @transform_1, window_bounds = array<i64: 16, 128>}, {transform_indices = @transform_2, window_bounds = array<i64: 1, 8, 128>}]} {
    %c0_i32 = arith.constant 0 : i32
    %0 = arith.cmpi eq, %arg1, %c0_i32 : i32
    %1 = arith.extui %0 : i1 to i32
    %c0_i32_0 = arith.constant 0 : i32
    %2 = arith.cmpi ne, %1, %c0_i32_0 : i32
    scf.if %2 {
      %cst_12 = arith.constant 0.000000e+00 : f32
      %24 = vector.broadcast %cst_12 : f32 to vector<8x128xf32>
      %c0_13 = arith.constant 0 : index
      %c0_14 = arith.constant 0 : index
      %25 = vector.load %arg6[%c0_13, %c0_14] : memref<8x128xf32, #tpu.memory_space<vmem>>, vector<8x128xf32>
      tpu.vector_store %arg6[%c0_13, %c0_14], %24 {strides = array<i32>} : memref<8x128xf32, #tpu.memory_space<vmem>>, vector<8x128xf32>,
    } else {
    }
    %c0 = arith.constant 0 : index
    %3 = memref.load %arg2[%c0] : memref<1xf32, #tpu.memory_space<smem>>
    %c1_i32 = arith.constant 1 : i32
    %4 = arith.muli %arg0, %c1_i32 : i32
    %5 = arith.addi %4, %arg1 : i32
    %c16_i32 = arith.constant 16 : i32
    %6 = arith.muli %5, %c16_i32 : i32
    %c16_i32_1 = arith.constant 16 : i32
    %7 = arith.subi %c16_i32_1, %6 : i32
    %c0_2 = arith.constant 0 : index
    %c0_3 = arith.constant 0 : index
    %8 = vector.load %arg3[%c0_2, %c0_3] : memref<16x128xf32, #tpu.memory_space<vmem>>, vector<16x128xf32>
    %c0_4 = arith.constant 0 : index
    %c0_5 = arith.constant 0 : index
    %9 = vector.load %arg4[%c0_4, %c0_5] : memref<16x128xf32, #tpu.memory_space<vmem>>, vector<16x128xf32>
    %10 = arith.subf %8, %9 : vector<16x128xf32>
    %11 = vector.broadcast %3 : f32 to vector<16x128xf32>
    %12 = arith.addf %10, %11 : vector<16x128xf32>
    %cst = arith.constant 0.000000e+00 : f32
    %13 = vector.broadcast %cst : f32 to vector<16x128xf32>
    %14 = arith.maximumf %12, %13 : vector<16x128xf32>
    %c16_i32_6 = arith.constant 16 : i32
    %15 = arith.cmpi sge, %7, %c16_i32_6 : i32
    %16 = arith.extui %15 : i1 to i32
    %c0_i32_7 = arith.constant 0 : i32
    %17 = arith.cmpi ne, %16, %c0_i32_7 : i32
    scf.if %17 {
      %c0_12 = arith.constant 0 : index
      %c0_13 = arith.constant 0 : index
      %24 = vector.load %arg6[%c0_12, %c0_13] : memref<8x128xf32, #tpu.memory_space<vmem>>, vector<8x128xf32>
      %25 = vector.shape_cast %14 : vector<16x128xf32> to vector<2x8x128xf32>
      %cst_14 = arith.constant dense<0.000000e+00> : vector<8x128xf32>
      %26 = vector.multi_reduction <add>, %25, %cst_14 [0] : vector<2x8x128xf32> to vector<8x128xf32>
      %27 = arith.addf %24, %26 : vector<8x128xf32>
      %c0_15 = arith.constant 0 : index
      %c0_16 = arith.constant 0 : index
      %28 = vector.load %arg6[%c0_15, %c0_16] : memref<8x128xf32, #tpu.memory_space<vmem>>, vector<8x128xf32>
      tpu.vector_store %arg6[%c0_15, %c0_16], %27 {strides = array<i32>} : memref<8x128xf32, #tpu.memory_space<vmem>>, vector<8x128xf32>,
    } else {
    }
    %c16_i32_8 = arith.constant 16 : i32
    %18 = arith.cmpi slt, %7, %c16_i32_8 : i32
    %19 = arith.extui %18 : i1 to i32
    %c0_i32_9 = arith.constant 0 : i32
    %20 = arith.cmpi ne, %19, %c0_i32_9 : i32
    scf.if %20 {
      %24 = tpu.iota {dimensions = array<i32: 0>} : vector<16x128xi32>
      %c0_12 = arith.constant 0 : index
      %c0_13 = arith.constant 0 : index
      %25 = vector.load %arg6[%c0_12, %c0_13] : memref<8x128xf32, #tpu.memory_space<vmem>>, vector<8x128xf32>
      %26 = vector.broadcast %7 : i32 to vector<16x128xi32>
      %27 = arith.cmpi slt, %24, %26 : vector<16x128xi32>
      %cst_14 = arith.constant 0.000000e+00 : f32
      %28 = vector.broadcast %cst_14 : f32 to vector<16x128xf32>
      %29 = arith.select %27, %14, %28 : vector<16x128xi1>, vector<16x128xf32>
      %30 = vector.shape_cast %29 : vector<16x128xf32> to vector<2x8x128xf32>
      %cst_15 = arith.constant dense<0.000000e+00> : vector<8x128xf32>
      %31 = vector.multi_reduction <add>, %30, %cst_15 [0] : vector<2x8x128xf32> to vector<8x128xf32>
      %32 = arith.addf %25, %31 : vector<8x128xf32>
      %c0_16 = arith.constant 0 : index
      %c0_17 = arith.constant 0 : index
      %33 = vector.load %arg6[%c0_16, %c0_17] : memref<8x128xf32, #tpu.memory_space<vmem>>, vector<8x128xf32>
      tpu.vector_store %arg6[%c0_16, %c0_17], %32 {strides = array<i32>} : memref<8x128xf32, #tpu.memory_space<vmem>>, vector<8x128xf32>,
    } else {
    }
    %c0_i32_10 = arith.constant 0 : i32
    %21 = arith.cmpi eq, %arg1, %c0_i32_10 : i32
    %22 = arith.extui %21 : i1 to i32
    %c0_i32_11 = arith.constant 0 : i32
    %23 = arith.cmpi ne, %22, %c0_i32_11 : i32
    scf.if %23 {
      %c0_12 = arith.constant 0 : index
      %c0_13 = arith.constant 0 : index
      %24 = vector.load %arg6[%c0_12, %c0_13] : memref<8x128xf32, #tpu.memory_space<vmem>>, vector<8x128xf32>
      %c0_14 = arith.constant 0 : index
      %c0_15 = arith.constant 0 : index
      %c0_16 = arith.constant 0 : index
      %25 = vector.load %arg5[%c0_14, %c0_15, %c0_16] : memref<1x8x128xf32, #tpu.memory_space<vmem>>, vector<1x8x128xf32>
      %26 = vector.shape_cast %25 : vector<1x8x128xf32> to vector<8x128xf32>
      %27 = vector.shape_cast %24 : vector<8x128xf32> to vector<1x8x128xf32>
      tpu.vector_store %arg5[%c0_14, %c0_15, %c0_16], %27 {strides = array<i32>} : memref<1x8x128xf32, #tpu.memory_space<vmem>>, vector<1x8x128xf32>,
    } else {
    }
    return
  }
  func.func @transform_0(%arg0: i32, %arg1: i32, %arg2: memref<1xf32, #tpu.memory_space<smem>>) -> (i32, i32) {
    %c1_i32 = arith.constant 1 : i32
    %0 = arith.muli %arg0, %c1_i32 : i32
    %1 = arith.addi %0, %arg1 : i32
    %c0_i32 = arith.constant 0 : i32
    %2 = arith.minsi %1, %c0_i32 : i32
    %c0_i32_0 = arith.constant 0 : i32
    %c0_i32_1 = arith.constant 0 : i32
    return %2, %c0_i32_0 : i32, i32
  }
  func.func @transform_1(%arg0: i32, %arg1: i32, %arg2: memref<1xf32, #tpu.memory_space<smem>>) -> (i32, i32) {
    %c1_i32 = arith.constant 1 : i32
    %0 = arith.muli %arg0, %c1_i32 : i32
    %1 = arith.addi %0, %arg1 : i32
    %c0_i32 = arith.constant 0 : i32
    %2 = arith.minsi %1, %c0_i32 : i32
    %c0_i32_0 = arith.constant 0 : i32
    %c0_i32_1 = arith.constant 0 : i32
    return %2, %c0_i32_0 : i32, i32
  }
  func.func @transform_2(%arg0: i32, %arg1: i32, %arg2: memref<1xf32, #tpu.memory_space<smem>>) -> (i32, i32, i32) {
    %c0_i32 = arith.constant 0 : i32
    %c0_i32_0 = arith.constant 0 : i32
    %c0_i32_1 = arith.constant 0 : i32
    return %arg0, %c0_i32, %c0_i32_0 : i32, i32, i32
  }
}

</mosaic_0001>

<bundles_post_ra>
// kernel: tpu_custom_call.1
= control target key start
LH: loop header
LB: loop body
LE: loop exit
PB: predicated region body
PF: predicated region fallthrough
CT: control target
= control target key end

     0   :  { %9 = vsyncpa [#allocation6], 0  ;;  %s257_s0 = inlined_call_operand.<no memory space> [shape: f32[1], index: 0, kind: input, shape index: {}]   ;;  %s258_s1 = inlined_call_operand.hbm [shape: f32[16,128], index: 1, kind: input, shape index: {}]   ;;  %s259_s2 = inlined_call_operand.hbm [shape: f32[16,128], index: 2, kind: input, shape index: {}]   ;;  %s260_s3 = inlined_call_operand.hbm [shape: f32[1,8,128], index: 3, kind: output, shape index: {}]  }
   0x1   :  { %10 = vsyncpa [#allocation9], 0 }
   0x2   :  { %11 = vsyncpa [#allocation7], 0  ;;  %s22_s14 = sshll.u32 %s258_s1, 4  ;;  %s220_s15 = smov [#allocation5]   ;;  %s23_s14 = int_to_ptr.hbm [resolvable:$true] %s22_s14 }
   0x3   :  { %s24_s16 = sshll.u32 %s220_s15, 4  ;;  %s41_s19 = sshll.u32 %s259_s2, 4  ;;  %s25_s16 = int_to_ptr.vmem [resolvable:$true] %s24_s16  ;;  %s42_s19 = int_to_ptr.hbm [resolvable:$true] %s41_s19 }
   0x4   :  { %s221_s20 = smov 128   ;;  %s222_s21 = smov 8  }
   0x5   :  { %30 = dma.hbm_to_vmem [thread:$0]  %s23_s14, 256, %s25_s16, [#allocation6], %s221_s20, %s221_s20, %s222_s21  }
   0x6   :  { %s223_s22 = smov [#allocation8]  }
   0x7   :  { %s43_s23 = sshll.u32 %s223_s22, 4  ;;  %s44_s23 = int_to_ptr.vmem [resolvable:$true] %s43_s23 }
   0x8   :  { %49 = dma.hbm_to_vmem [thread:$0]  %s42_s19, 256, %s44_s23, [#allocation9], %s221_s20, %s221_s20, %s222_s21  }
   0x9   :  { %214 = dma.done.wait [#allocation6], 256  }
   0xa   :  { %215 = vsyncadd [#allocation6], 4294967040 }
   0xb   :  { %216 = dma.done.wait [#allocation9], 256  }
   0xc   :  { %217 = vsyncadd [#allocation9], 4294967040  ;;  %v75_v0 = vld [vmem:[#allocation5] sm:$0xff]  ;;  %v76_v1 = vld [vmem:[#allocation5 + $0x8] sm:$0xff]  ;;  %v81_v3 = vstv %s257_s0  ;;  %s224_s2 = smov [#allocation10]   ;;  %s122_s28 = sshll.u32 %s260_s3, 4  ;;  %s123_s28 = int_to_ptr.hbm [resolvable:$true] %s122_s28 }
   0xd   :  { %v77_v2 = vld [vmem:[#allocation8] sm:$0xff]  ;;  %v78_v4 = vld [vmem:[#allocation8 + $0x8] sm:$0xff]  ;;  %s120_s25 = sshll.u32 %s224_s2, 4  ;;  %s121_s25 = int_to_ptr.vmem [resolvable:$true] %s120_s25 }
   0xe   :  { %v79_v5 = vsub.f32 %v75_v0, %v77_v2  ;;  %v80_v6 = vsub.f32 %v76_v1, %v78_v4 }
  0x10   :  { %v82_v7 = vadd.f32 %v81_v3, %v79_v5  ;;  %v83_v8 = vadd.f32 %v81_v3, %v80_v6 }
  0x12   :  { %v84_v9 = vmax.f32 %v82_v7, 0.0  ;;  %v85_v10 = vmax.f32 %v83_v8, 0.0 }
  0x14   :  { %v91_v11 = vadd.f32 %v85_v10, %v84_v9 }
  0x16   :  { %114 = vst [vmem:[#allocation10] sm:$0xff] %v91_v11 }
  0x17   :  { %125 = dma.vmem_to_hbm [thread:$0]  %s121_s25, 128, %s123_s28, [#allocation7]  }
  0x18   :  { %218 = dma.done.wait [#allocation7], 128  }
  0x19   :  { %219 = vsyncadd [#allocation7], 4294967168 }
  0x1a   :  { %130 = vsyncpa [#allocation6], 1 }
  0x1b   :  { %131 = vsyncpa [#allocation9], 1 }
  0x1c   :  { %132 = vsyncpa [#allocation7], 1 }

</bundles_post_ra>
